<compile_context>
chip_gen: v7x
topology: tpu7x:2x2x1
jax: 0.10.0
libtpu: 0.0.40
codegen_flags: <defaults>
</compile_context>

<pallas_src>
import numpy as np

import jax
import jax.numpy as jnp
from jax.experimental import pallas as pl
from jax.experimental.pallas import tpu as pltpu


def _round_up(n, m):
    return ((n + m - 1) // m) * m


def _cdiv(a, b):
    return -(-a // b)


def _context_net_kernel(x_ref, wih_ref, bih_ref, who_ref, bho_ref, y_ref):
    # h = relu(x @ W_ih^T + b_ih)   -- MXU matmul, f32 accumulation.
    h = jnp.dot(x_ref[...], wih_ref[...], preferred_element_type=jnp.float32)
    h = jnp.maximum(h + bih_ref[...], 0.0)
    # tanh(c_input) is pre-folded into who_ref (= diag(tanh(c)) @ W_ho^T), so
    # this matmul directly produces the gated projection.
    z = jnp.dot(h.astype(who_ref.dtype), who_ref[...],
                preferred_element_type=jnp.float32)
    # Elementwise (bias add, tanh) kept in f32 (v5e has no bf16 VPU/EUP path).
    y_ref[...] = jnp.tanh(z + bho_ref[...])


def _vmem_tile_bytes(rows, cols, itemsize):
    """Conservative VMEM footprint of a (rows, cols) array: pad to the
    (sublane, 128-lane) layout granule."""
    sub = 16 if itemsize == 2 else 8
    return _round_up(max(rows, 1), sub) * _round_up(max(cols, 1), 128) * itemsize


def simple_context_network_v2_forward(x, w_ih, b_ih, w_ho, b_ho, c_input,
                                      *, tile_b=4096, compute_dtype=jnp.float32):
    """x: (B, D_in). w_ih: (D_hidden, D_in) (torch layout). w_ho: (D_out, D_hidden).
    b_ih: (D_hidden,), b_ho: (D_out,), c_input: (D_hidden,). Returns (B, D_out) f32."""
    B, d_in = x.shape
    d_hidden = w_ih.shape[0]
    d_out = w_ho.shape[0]
    if c_input.shape[0] != d_hidden:
        raise ValueError(
            f"dim_cinput ({c_input.shape[0]}) must equal dim_hidden ({d_hidden}) "
            "for the elementwise context gate.")

    itemsize = int(np.dtype(compute_dtype).itemsize)
    align = 16 if itemsize == 2 else 8  # bf16 packs sublanes in pairs

    # ---- one-time parameter prep in plain JAX (constant across batch tiles) ----
    cr = jnp.tanh(c_input.astype(jnp.float32))                          # (D_hidden,)
    wih_t = w_ih.T.astype(compute_dtype)                                # (D_in, D_hidden)
    who_scaled = (cr[:, None] * w_ho.T.astype(jnp.float32)).astype(compute_dtype)
    bih2 = b_ih.reshape(1, d_hidden).astype(jnp.float32)                # (1, D_hidden)
    bho2 = b_ho.reshape(1, d_out).astype(jnp.float32)                   # (1, D_out)

    # ---- batch tiling: large sublane-aligned tiles, pad the tail tile --------
    b_aligned = _round_up(B, align)
    tb = _round_up(max(align, min(tile_b, b_aligned)), align)
    steps = _cdiv(b_aligned, tb)
    # v7x megacore: prefer an even number (>=2) of grid steps so both
    # TensorCores get batch tiles under dimension_semantics=("parallel",).
    if steps > 1 and steps % 2 == 1:
        tb_alt = _round_up(_cdiv(b_aligned, steps + 1), align)
        steps_alt = _cdiv(b_aligned, tb_alt)
        if steps_alt % 2 == 0:
            tb, steps = tb_alt, steps_alt
    b_pad = steps * tb

    x_p = x.astype(compute_dtype)
    if b_pad != B:
        x_p = jnp.pad(x_p, ((0, b_pad - B), (0, 0)))
    grid = (steps,)

    # ---- scoped-VMEM limit: double-buffered streamed tiles + resident params --
    footprint = (
        2 * _vmem_tile_bytes(tb, d_in, itemsize)      # x tile, double-buffered
        + 2 * _vmem_tile_bytes(tb, d_out, 4)          # y tile, double-buffered
        + _vmem_tile_bytes(d_in, d_hidden, itemsize)  # resident W_ih^T
        + _vmem_tile_bytes(d_hidden, d_out, itemsize) # resident gated W_ho^T
        + _vmem_tile_bytes(1, d_hidden, 4)
        + _vmem_tile_bytes(1, d_out, 4)
    )
    vmem_limit = int(min(48 << 20, max(footprint + (4 << 20), 32 << 20)))

    cost = pl.CostEstimate(
        flops=2 * b_pad * (d_in * d_hidden + d_hidden * d_out),
        transcendentals=b_pad * d_out,
        bytes_accessed=(itemsize * (b_pad * d_in + d_in * d_hidden + d_hidden * d_out)
                        + 4 * (b_pad * d_out + d_hidden + d_out)),
    )

    y_p = pl.pallas_call(
        _context_net_kernel,
        out_shape=jax.ShapeDtypeStruct((b_pad, d_out), jnp.float32),
        grid_spec=pltpu.PrefetchScalarGridSpec(
            num_scalar_prefetch=0,
            grid=grid,
            in_specs=[
                pl.BlockSpec((tb, d_in), lambda i: (i, 0)),         # streamed x tile
                pl.BlockSpec((d_in, d_hidden), lambda i: (0, 0)),   # resident weights
                pl.BlockSpec((1, d_hidden), lambda i: (0, 0)),      # resident bias
                pl.BlockSpec((d_hidden, d_out), lambda i: (0, 0)),  # resident gated weights
                pl.BlockSpec((1, d_out), lambda i: (0, 0)),         # resident bias
            ],
            # Unpadded output: last dim equals the full array extent, so the
            # writeback moves only d_out columns (no 128-lane pad inflation).
            out_specs=pl.BlockSpec((tb, d_out), lambda i: (i, 0)),
        ),
        compiler_params=pltpu.CompilerParams(
            dimension_semantics=("parallel",),  # v7x: shard batch tiles over 2 TCs
            vmem_limit_bytes=vmem_limit,
        ),
        cost_estimate=cost,
    )(x_p, wih_t, bih2, who_scaled, bho2)

    return y_p[:B, :]


def init_params(key, dim_input, dim_hidden, dim_output, dim_cinput):
    """Deterministic init matching the module's __init__ recipe:
    orthogonal weights, bias = 0.1, c_input = relu(uniform[0,1))."""
    k_ih, k_ho, k_c = jax.random.split(key, 3)
    ortho = jax.nn.initializers.orthogonal()
    w_ih = ortho(k_ih, (dim_hidden, dim_input), jnp.float32)
    w_ho = ortho(k_ho, (dim_output, dim_hidden), jnp.float32)
    b_ih = jnp.full((dim_hidden,), 0.1, dtype=jnp.float32)
    b_ho = jnp.full((dim_output,), 0.1, dtype=jnp.float32)
    c_input = jax.nn.relu(jax.random.uniform(k_c, (dim_cinput,), jnp.float32))
    return w_ih, b_ih, w_ho, b_ho, c_input


def _reference_forward(x, w_ih, b_ih, w_ho, b_ho, c_input):
    h = jax.nn.relu(x @ w_ih.T + b_ih)
    cr = jnp.tanh(c_input)
    return jnp.tanh((cr * h) @ w_ho.T + b_ho)


if __name__ == "__main__":
    # dim_cinput must equal dim_hidden for the elementwise gate (as in the module).
    dim_input, dim_hidden, dim_output = 16, 32, 4
    dim_cinput = dim_hidden

    key = jax.random.PRNGKey(0)
    k_x, k_x2, k_x3, k_p = jax.random.split(key, 4)
    w_ih, b_ih, w_ho, b_ho, c_input = init_params(
        k_p, dim_input, dim_hidden, dim_output, dim_cinput
    )

    # Small batch (single tile).
    B = 8
    x = jax.random.normal(k_x, (B, dim_input), dtype=jnp.float32)
    y = jax.block_until_ready(
        simple_context_network_v2_forward(x, w_ih, b_ih, w_ho, b_ho, c_input)
    )
    y_ref = _reference_forward(x, w_ih, b_ih, w_ho, b_ho, c_input)
    assert y.shape == (B, dim_output)
    assert jnp.allclose(y, y_ref, atol=1e-5, rtol=1e-5)

    # Batch not a multiple of the sublane/tile size (exercises tail padding path).
    B2 = 20
    x2 = jax.random.normal(k_x2, (B2, dim_input), dtype=jnp.float32)
    y2 = jax.block_until_ready(
        simple_context_network_v2_forward(x2, w_ih, b_ih, w_ho, b_ho, c_input)
    )
    y2_ref = _reference_forward(x2, w_ih, b_ih, w_ho, b_ho, c_input)
    assert y2.shape == (B2, dim_output)
    assert jnp.allclose(y2, y2_ref, atol=1e-5, rtol=1e-5)

    # Multi-tile path (exercises streamed x / even-grid logic) with a small tile.
    B3 = 200
    x3 = jax.random.normal(k_x3, (B3, dim_input), dtype=jnp.float32)
    y3 = jax.block_until_ready(
        simple_context_network_v2_forward(x3, w_ih, b_ih, w_ho, b_ho, c_input,
                                          tile_b=64)
    )
    y3_ref = _reference_forward(x3, w_ih, b_ih, w_ho, b_ho, c_input)
    assert y3.shape == (B3, dim_output)
    assert jnp.allclose(y3, y3_ref, atol=1e-5, rtol=1e-5)

    print("KERNEL_OK")
</pallas_src>

<mosaic_0001>
module attributes {stable_mosaic.version = 11 : i64} {
  func.func @_context_net_kernel(%arg0: i32, %arg1: memref<8x16xf32, #tpu.memory_space<vmem>>, %arg2: memref<16x32xf32, #tpu.memory_space<vmem>>, %arg3: memref<1x32xf32, #tpu.memory_space<vmem>>, %arg4: memref<32x4xf32, #tpu.memory_space<vmem>>, %arg5: memref<1x4xf32, #tpu.memory_space<vmem>>, %arg6: memref<8x4xf32, #tpu.memory_space<vmem>>) attributes {dimension_semantics = [#tpu.dimension_semantics<parallel>], iteration_bounds = array<i64: 1>, scalar_prefetch = 0 : i64, scratch_operands = 0 : i64, tpu.core_type = #tpu.core_type<tc>, window_params = [{transform_indices = @transform_0, window_bounds = array<i64: 8, 16>}, {pipeline_mode = #tpu.pipeline_mode<synchronous>, transform_indices = @transform_1, window_bounds = array<i64: 16, 32>}, {pipeline_mode = #tpu.pipeline_mode<synchronous>, transform_indices = @transform_2, window_bounds = array<i64: 1, 32>}, {pipeline_mode = #tpu.pipeline_mode<synchronous>, transform_indices = @transform_3, window_bounds = array<i64: 32, 4>}, {pipeline_mode = #tpu.pipeline_mode<synchronous>, transform_indices = @transform_4, window_bounds = array<i64: 1, 4>}, {transform_indices = @transform_5, window_bounds = array<i64: 8, 4>}]} {
    %c0 = arith.constant 0 : index
    %c0_0 = arith.constant 0 : index
    %0 = vector.load %arg1[%c0, %c0_0] : memref<8x16xf32, #tpu.memory_space<vmem>>, vector<8x16xf32>
    %c0_1 = arith.constant 0 : index
    %c0_2 = arith.constant 0 : index
    %1 = vector.load %arg2[%c0_1, %c0_2] : memref<16x32xf32, #tpu.memory_space<vmem>>, vector<16x32xf32>
    %cst = arith.constant dense<0.000000e+00> : vector<8x32xf32>
    %2 = tpu.matmul %0, %1, %cst {dimension_numbers = #tpu.dot_dimension_numbers<[1], [0], [0], [1], [0, 0, 1, 1], [], []>} : vector<8x16xf32>, vector<16x32xf32>, vector<8x32xf32> -> vector<8x32xf32>
    %c0_3 = arith.constant 0 : index
    %c0_4 = arith.constant 0 : index
    %3 = vector.load %arg3[%c0_3, %c0_4] : memref<1x32xf32, #tpu.memory_space<vmem>>, vector<1x32xf32>
    %4 = vector.broadcast %3 : vector<1x32xf32> to vector<8x32xf32>
    %5 = arith.addf %2, %4 : vector<8x32xf32>
    %cst_5 = arith.constant 0.000000e+00 : f32
    %6 = vector.broadcast %cst_5 : f32 to vector<8x32xf32>
    %7 = arith.maximumf %5, %6 : vector<8x32xf32>
    %c0_6 = arith.constant 0 : index
    %c0_7 = arith.constant 0 : index
    %8 = vector.load %arg4[%c0_6, %c0_7] : memref<32x4xf32, #tpu.memory_space<vmem>>, vector<32x4xf32>
    %cst_8 = arith.constant dense<0.000000e+00> : vector<8x4xf32>
    %9 = tpu.matmul %7, %8, %cst_8 {dimension_numbers = #tpu.dot_dimension_numbers<[1], [0], [0], [1], [0, 0, 1, 1], [], []>} : vector<8x32xf32>, vector<32x4xf32>, vector<8x4xf32> -> vector<8x4xf32>
    %c0_9 = arith.constant 0 : index
    %c0_10 = arith.constant 0 : index
    %10 = vector.load %arg5[%c0_9, %c0_10] : memref<1x4xf32, #tpu.memory_space<vmem>>, vector<1x4xf32>
    %11 = vector.broadcast %10 : vector<1x4xf32> to vector<8x4xf32>
    %12 = arith.addf %9, %11 : vector<8x4xf32>
    %13 = math.tanh %12 : vector<8x4xf32>
    %c0_11 = arith.constant 0 : index
    %c0_12 = arith.constant 0 : index
    %14 = vector.load %arg6[%c0_11, %c0_12] : memref<8x4xf32, #tpu.memory_space<vmem>>, vector<8x4xf32>
    tpu.vector_store %arg6[%c0_11, %c0_12], %13 {strides = array<i32>} : memref<8x4xf32, #tpu.memory_space<vmem>>, vector<8x4xf32>,
    return
  }
  func.func @transform_0(%arg0: i32) -> (i32, i32) {
    %c0_i32 = arith.constant 0 : i32
    %c0_i32_0 = arith.constant 0 : i32
    return %arg0, %c0_i32 : i32, i32
  }
  func.func @transform_1(%arg0: i32) -> (i32, i32) {
    %c0_i32 = arith.constant 0 : i32
    %c0_i32_0 = arith.constant 0 : i32
    %c0_i32_1 = arith.constant 0 : i32
    return %c0_i32, %c0_i32_0 : i32, i32
  }
  func.func @transform_2(%arg0: i32) -> (i32, i32) {
    %c0_i32 = arith.constant 0 : i32
    %c0_i32_0 = arith.constant 0 : i32
    %c0_i32_1 = arith.constant 0 : i32
    return %c0_i32, %c0_i32_0 : i32, i32
  }
  func.func @transform_3(%arg0: i32) -> (i32, i32) {
    %c0_i32 = arith.constant 0 : i32
    %c0_i32_0 = arith.constant 0 : i32
    %c0_i32_1 = arith.constant 0 : i32
    return %c0_i32, %c0_i32_0 : i32, i32
  }
  func.func @transform_4(%arg0: i32) -> (i32, i32) {
    %c0_i32 = arith.constant 0 : i32
    %c0_i32_0 = arith.constant 0 : i32
    %c0_i32_1 = arith.constant 0 : i32
    return %c0_i32, %c0_i32_0 : i32, i32
  }
  func.func @transform_5(%arg0: i32) -> (i32, i32) {
    %c0_i32 = arith.constant 0 : i32
    %c0_i32_0 = arith.constant 0 : i32
    return %arg0, %c0_i32 : i32, i32
  }
}

</mosaic_0001>

<bundles_post_ra>
// kernel: tpu_custom_call.1
= control target key start
LH: loop header
LB: loop body
LE: loop exit
PB: predicated region body
PF: predicated region fallthrough
CT: control target
= control target key end

     0   :  { %v241_v0 = vmov 0.0|0.0   ;;  %vm242_vm0 = vmmov 0   ;;  %v243_v3 = vmov 0.0   ;;  %vm30_vm1 = vcmask 130048   ;;  %s304_s1 = inlined_call_operand.vmem [shape: f32[16,32], index: 1, kind: input, shape index: {}]   ;;  %s305_s3 = inlined_call_operand.vmem [shape: f32[32,4], index: 3, kind: input, shape index: {}]   ;;  %s306_s0 = inlined_call_operand.vmem [shape: f32[8,16], index: 0, kind: input, shape index: {}]   ;;  %s307_s2 = inlined_call_operand.vmem [shape: f32[1,32], index: 2, kind: input, shape index: {}]   ;;  %s308_s4 = inlined_call_operand.vmem [shape: f32[1,4], index: 4, kind: input, shape index: {}]   ;;  %s309_s5 = inlined_call_operand.vmem [shape: f32[8,4], index: 5, kind: output, shape index: {}]  }
   0x1   :  { %227 = vmatprep.subr.bf16.mxu0 %v241_v0  ;;  %v21_v1 = vld [vmem:[%s304_s1] sm:$0xff]  ;;  %v22_v2 = vld [vmem:[%s304_s1 + $0x8] sm:$0xff]  ;;  %213 = vmatprep.mubr.msk.f32.mxu0 %vm242_vm0, %v243_v3  ;;  %v107_v9 = vld [vmem:[%s305_s3 + $0x10] sm:$0xff]  ;;  %vm116_vm2 = vcmask 261120   ;;  %vm191_vm3 = vcmask 31744  }
   0x2   :  { %v228_v4 = vpack.c.bf16 %v22_v2, %v21_v1  ;;  %230 = vmatprep.subr.bf16.mxu1 %v241_v0  ;;  %v105_v5 = vld [vmem:[%s305_s3] sm:$0xff]  ;;  %v106_v6 = vld [vmem:[%s305_s3 + $0x8] sm:$0xff]  ;;  %224 = vmatprep.mubr.msk.f32.mxu1 %vm242_vm0, %v243_v3  ;;  %v108_v10 = vld [vmem:[%s305_s3 + $0x18] sm:$0xff] }
   0x3   :  { %v231_v7 = vpack.c.bf16 %v106_v6, %v105_v5  ;;  %v20_v8 = vld [vmem:[%s306_s0] sm:$0xff]  ;;  %v234_v11 = vpack.c.bf16 %v108_v10, %v107_v9 }
   0x4   :  { %229 = vmatpush3.bf16.msra.mxu0 %v228_v4  ;;  %v197_v12 = vld [vmem:[%s307_s2] ss:$0 sm:$0xff] }
   0x5   :  { %232 = vmatpush3.bf16.msra.mxu1 %v231_v7  ;;  %v199_v17 = vld [vmem:[%s308_s4] ss:$0 sm:$0xff] }
   0x6   :  { %233 = vmatprep.subr.bf16.mxu1 %v241_v0 }
   0x7   :  { %214 = vmatmul.mubr.msk.f32.vlgmr.msra.gmra.mrb[0].mxu0 %vm30_vm1, %v20_v8 }
   0x9   :  { %235 = vmatpush3.bf16.msra.mxu1 %v234_v11 }
  0xda   :  { %v100_v13 = vpop.f32.mrb[0].mxu0 }
  0xdb   :  { %v101_v14 = vadd.f32 %v197_v12, %v100_v13  ;;  %v215_v15 = vpop.f32.mrb[1].mxu0 }
  0xdd   :  { %v104_v16 = vmax.f32 %v101_v14, 0.0 }
  0xdf   :  { %225 = vmatmul.mubr.msk.f32.vlgmr.msra.gmra.mrb[0].mxu1 %vm116_vm2, %v104_v16 }
 0x1b2   :  { %v186_v18 = vpop.f32.mrb[0].mxu1 }
 0x1b3   :  { %v187_v19 = vadd.f32 %v199_v17, %v186_v18  ;;  %v226_v20 = vpop.f32.mrb[1].mxu1 }
 0x1b5   :  { %239 = vtanh.f32 %v187_v19 }
 0x1bf   :  { %v240_v21 = vpop.eup %239 }
 0x1c0   :  { %192 = vst.msk [vmem:[%s309_s5] sm:$0xff] %vm191_vm3, %v240_v21 }

</bundles_post_ra>
